<compile_context>
chip_gen: v7x
topology: tpu7x:2x2x1
jax: 0.10.0
libtpu: 0.0.40
codegen_flags: <defaults>
</compile_context>

<pallas_src>
import functools

import jax
import jax.numpy as jnp
from jax.experimental import pallas as pl
from jax.experimental.pallas import tpu as pltpu

_LANES = 128
_SUBLANES = 8
_MAX_BLOCK_ROWS = 8192   # 8192 * 128 * 4B = 4 MiB per f32 input tile
_SUB_ROWS = 1024         # strip-mining granularity inside one block


def _ceil_div(a: int, b: int) -> int:
    return -(-a // b)


def _round_up(a: int, b: int) -> int:
    return _ceil_div(a, b) * b


def _sublane_multiple(dtype) -> int:
    # Sublane tile: 8 rows for 4-byte dtypes, 16 for 2-byte, 32 for 1-byte.
    itemsize = jnp.dtype(dtype).itemsize
    return max(8, 32 // max(1, min(4, itemsize)))


def _make_kernel(gamma: int, smooth: float, total: int,
                 block_rows: int, sub_rows: int):
    """Kernel producing per-block partial sums of
       [sum(core*pos_mask), sum(core*neg_mask), num_pos, num_neg],
       each folded to an (8, 128) slab (cross-lane reduce deferred to JAX)."""
    n_sub, rem_rows = divmod(block_rows, sub_rows)   # rem_rows is a mult of 8

    def fold(x):
        # (k*8, 128) -> (8, 128): elementwise vreg adds only (no XLU).
        return jnp.sum(x.reshape(-1, _SUBLANES, _LANES), axis=0)

    def kernel(out_ref, tgt_ref, partial_ref):
        # NOTE: flat element indices are int32 -> assumes total < 2**31.
        blk_elem0 = pl.program_id(0) * (block_rows * _LANES)

        # Flat-index template for one sub-slab; hoisted (JAX does not CSE
        # broadcast_in_dim, and it is loop-invariant).
        row_ids = jax.lax.broadcasted_iota(jnp.int32, (sub_rows, _LANES), 0)
        lane_ids = jax.lax.broadcasted_iota(jnp.int32, (sub_rows, _LANES), 1)
        local_idx = row_ids * _LANES + lane_ids

        def slab(start_row, nrows, idx_template):
            rows_sl = pl.ds(start_row, nrows)
            out_raw = out_ref[rows_sl, :].astype(jnp.float32)
            tgt = tgt_ref[rows_sl, :].astype(jnp.float32)

            # Validity: covers the wrapper's <128-element reshape pad AND the
            # undefined OOB region of a partial last grid block.
            idx = idx_template + (blk_elem0 + start_row * _LANES)
            valid = idx < total

            # Sanitize prob on invalid lanes so OOB NaN/garbage cannot poison
            # the sums (NaN * 0 == NaN); clip keeps log finite everywhere else.
            prob = jnp.where(
                valid,
                jnp.clip(out_raw, jnp.float32(smooth), jnp.float32(1.0 - smooth)),
                jnp.float32(0.5))

            pos_b = jnp.logical_and(tgt == 1.0, valid)
            neg_b = jnp.logical_and(tgt == 0.0, valid)
            pos_m = pos_b.astype(jnp.float32)
            neg_m = neg_b.astype(jnp.float32)

            # One log + one pow via select:
            #   pos: (1-p)^g * log(p),  neg: p^g * log(1-p)
            base = jnp.where(pos_b, prob, 1.0 - prob)
            core = ((1.0 - base) ** gamma) * jnp.log(base)

            return (fold(core * pos_m), fold(core * neg_m),
                    fold(pos_m), fold(neg_m))

        zero = jnp.zeros((_SUBLANES, _LANES), jnp.float32)
        acc = (zero, zero, zero, zero)

        if n_sub == 1 and rem_rows == 0:
            acc = slab(0, sub_rows, local_idx)
        else:
            if n_sub > 0:
                def body(s, carry):
                    start = pl.multiple_of(s * sub_rows, sub_rows)
                    d = slab(start, sub_rows, local_idx)
                    return tuple(c + x for c, x in zip(carry, d))
                acc = jax.lax.fori_loop(0, n_sub, body, acc, unroll=True)
            if rem_rows:
                d = slab(n_sub * sub_rows, rem_rows, local_idx[:rem_rows])
                acc = tuple(c + x for c, x in zip(acc, d))

        partial_ref[0] = acc[0]   # sum((1-p)^g log(p) * pos_mask)
        partial_ref[1] = acc[1]   # sum(p^g log(1-p) * neg_mask)
        partial_ref[2] = acc[2]   # num_pos
        partial_ref[3] = acc[3]   # num_neg

    return kernel


@functools.partial(jax.jit, static_argnames=("alpha", "gamma", "smooth"))
def binary_focal_loss(output: jax.Array, target: jax.Array,
                      alpha=(0.25, 0.75), gamma: int = 2,
                      smooth: float = 1e-6) -> jax.Array:
    """Pallas equivalent of BinaryFocalLoss(alpha, gamma).forward(output, target)."""
    assert output.shape == target.shape
    total = int(output.size)

    # Native dtypes, free flatten; pad < 128 elements only if lane-misaligned.
    out_flat = output.reshape(-1)
    tgt_flat = target.reshape(-1)
    arr_rows = _ceil_div(total, _LANES)
    lane_pad = arr_rows * _LANES - total
    if lane_pad:
        out_flat = jnp.pad(out_flat, (0, lane_pad))   # values masked in-kernel
        tgt_flat = jnp.pad(tgt_flat, (0, lane_pad))
    out2d = out_flat.reshape(arr_rows, _LANES)
    tgt2d = tgt_flat.reshape(arr_rows, _LANES)

    m_req = max(_sublane_multiple(out2d.dtype), _sublane_multiple(tgt2d.dtype))
    block_rows = min(_MAX_BLOCK_ROWS, _round_up(arr_rows, m_req))
    num_blocks = _ceil_div(arr_rows, block_rows)
    if num_blocks == 1 and arr_rows > m_req:
        # Guarantee >= 2 grid steps so v7x's 2 TensorCores both get work.
        block_rows = _round_up(_ceil_div(arr_rows, 2), m_req)
        num_blocks = _ceil_div(arr_rows, block_rows)
    sub_rows = min(_SUB_ROWS, block_rows)

    kernel = _make_kernel(int(gamma), float(smooth), total, block_rows, sub_rows)

    # VMEM budget from actual buffer math (2 double-buffered inputs + temps),
    # clamped so it stays comfortable on v7x's 64 MiB physical VMEM.
    itemsz = out2d.dtype.itemsize + tgt2d.dtype.itemsize
    dbl_buf_bytes = 2 * block_rows * _LANES * itemsz
    temp_bytes = 12 * sub_rows * _LANES * 4
    vmem_limit = max(32 * 1024 * 1024,
                     min(60 * 1024 * 1024,
                         int(1.25 * (dbl_buf_bytes + temp_bytes))))

    partials = pl.pallas_call(
        kernel,
        out_shape=jax.ShapeDtypeStruct((num_blocks, 4, _SUBLANES, _LANES),
                                       jnp.float32),
        grid_spec=pltpu.PrefetchScalarGridSpec(
            num_scalar_prefetch=0,
            grid=(num_blocks,),
            in_specs=[
                pl.BlockSpec((block_rows, _LANES), lambda i: (i, 0)),
                pl.BlockSpec((block_rows, _LANES), lambda i: (i, 0)),
            ],
            out_specs=pl.BlockSpec((None, 4, _SUBLANES, _LANES),
                                   lambda i: (i, 0, 0, 0)),
        ),
        compiler_params=pltpu.CompilerParams(
            dimension_semantics=("parallel",),
            vmem_limit_bytes=vmem_limit,
        ),
        cost_estimate=pl.CostEstimate(
            flops=14 * arr_rows * _LANES,
            transcendentals=arr_rows * _LANES,
            bytes_accessed=arr_rows * _LANES * itemsz
            + num_blocks * 4 * _SUBLANES * _LANES * 4,
        ),
    )(out2d, tgt2d)

    # Tiny epilogue: cross-lane reduce of the partials, alpha scaling, and the
    # data-dependent `if num_pos == 0` branch as a select.
    sums = jnp.sum(partials, axis=(0, 2, 3))          # -> (4,)
    pos_sum = (-float(alpha[0])) * sums[0]
    neg_sum = (-float(alpha[1])) * sums[1]
    num_pos, num_neg = sums[2], sums[3]
    # NOTE: num_neg == 0 with num_pos > 0 yields 0/0 = NaN, matching the
    # PyTorch reference's behaviour.
    return jnp.where(num_pos == 0.0, neg_sum,
                     pos_sum / num_pos + neg_sum / num_neg)


def binary_focal_loss_ref(output, target, alpha=(0.25, 0.75), gamma=2,
                          smooth=1e-6):
    """Pure-JAX reference matching the PyTorch module's forward."""
    prob = jnp.clip(output.astype(jnp.float32), smooth, 1.0 - smooth)
    tgt = target.astype(jnp.float32)
    pos_mask = (tgt == 1).astype(jnp.float32)
    neg_mask = (tgt == 0).astype(jnp.float32)
    pos_loss = -alpha[0] * (1.0 - prob) ** gamma * jnp.log(prob) * pos_mask
    neg_loss = -alpha[1] * prob ** gamma * jnp.log(1.0 - prob) * neg_mask
    pos_sum = pos_loss.sum()
    neg_sum = neg_loss.sum()
    num_pos = pos_mask.sum()
    num_neg = neg_mask.sum()
    return jnp.where(num_pos == 0, neg_sum,
                     pos_sum / num_pos + neg_sum / num_neg)


if __name__ == "__main__":
    key = jax.random.PRNGKey(0)
    k1, k2, k3, k4 = jax.random.split(key, 4)

    # Test 1: canonical NCHW case (lane-aligned, no padding path).
    N, C, H, W = 2, 4, 16, 16
    output = jax.random.uniform(k1, (N, C, H, W), dtype=jnp.float32,
                                minval=0.01, maxval=0.99)
    target = jax.random.bernoulli(k2, 0.5, (N, C, H, W)).astype(jnp.float32)
    loss = jax.block_until_ready(binary_focal_loss(output, target))
    ref = binary_focal_loss_ref(output, target)
    assert jnp.allclose(loss, ref, rtol=1e-5, atol=1e-5), (loss, ref)

    # Test 2: lane-misaligned size + int32 targets (exercises the in-kernel
    # validity mask, partial last block, and native-dtype target path).
    shape2 = (3, 5, 7, 11)   # 1155 elements, not a multiple of 128
    output2 = jax.random.uniform(k3, shape2, dtype=jnp.float32,
                                 minval=0.01, maxval=0.99)
    target2 = jax.random.bernoulli(k4, 0.3, shape2).astype(jnp.int32)
    loss2 = jax.block_until_ready(binary_focal_loss(output2, target2))
    ref2 = binary_focal_loss_ref(output2, target2)
    assert jnp.allclose(loss2, ref2, rtol=1e-5, atol=1e-5), (loss2, ref2)

    print("KERNEL_OK")
</pallas_src>

<mosaic_0001>
module attributes {stable_mosaic.version = 11 : i64} {
  func.func @kernel(%arg0: i32, %arg1: memref<8x128xf32, #tpu.memory_space<vmem>>, %arg2: memref<8x128xf32, #tpu.memory_space<vmem>>, %arg3: memref<1x4x8x128xf32, #tpu.memory_space<vmem>>) attributes {dimension_semantics = [#tpu.dimension_semantics<parallel>], iteration_bounds = array<i64: 2>, scalar_prefetch = 0 : i64, scratch_operands = 0 : i64, tpu.core_type = #tpu.core_type<tc>, window_params = [{transform_indices = @transform_0, window_bounds = array<i64: 8, 128>}, {transform_indices = @transform_1, window_bounds = array<i64: 8, 128>}, {transform_indices = @transform_2, window_bounds = array<i64: 1, 4, 8, 128>}]} {
    %c1024_i32 = arith.constant 1024 : i32
    %0 = arith.muli %arg0, %c1024_i32 : i32
    %1 = tpu.iota {dimensions = array<i32: 0>} : vector<8x128xi32>
    %2 = tpu.iota {dimensions = array<i32: 1>} : vector<8x128xi32>
    %c128_i32 = arith.constant 128 : i32
    %3 = vector.broadcast %c128_i32 : i32 to vector<8x128xi32>
    %4 = arith.muli %1, %3 : vector<8x128xi32>
    %5 = arith.addi %4, %2 : vector<8x128xi32>
    %c0 = arith.constant 0 : index
    %c0_0 = arith.constant 0 : index
    %6 = vector.load %arg1[%c0, %c0_0] : memref<8x128xf32, #tpu.memory_space<vmem>>, vector<8x128xf32>
    %c0_1 = arith.constant 0 : index
    %c0_2 = arith.constant 0 : index
    %7 = vector.load %arg2[%c0_1, %c0_2] : memref<8x128xf32, #tpu.memory_space<vmem>>, vector<8x128xf32>
    %c0_i32 = arith.constant 0 : i32
    %8 = arith.addi %0, %c0_i32 : i32
    %9 = vector.broadcast %8 : i32 to vector<8x128xi32>
    %10 = arith.addi %5, %9 : vector<8x128xi32>
    %c2048_i32 = arith.constant 2048 : i32
    %11 = vector.broadcast %c2048_i32 : i32 to vector<8x128xi32>
    %12 = arith.cmpi slt, %10, %11 : vector<8x128xi32>
    %cst = arith.constant 9.99999997E-7 : f32
    %cst_3 = arith.constant 0.999998986 : f32
    %13 = vector.broadcast %cst : f32 to vector<8x128xf32>
    %14 = arith.maximumf %13, %6 : vector<8x128xf32>
    %15 = vector.broadcast %cst_3 : f32 to vector<8x128xf32>
    %16 = arith.minimumf %15, %14 : vector<8x128xf32>
    %cst_4 = arith.constant 5.000000e-01 : f32
    %17 = vector.broadcast %cst_4 : f32 to vector<8x128xf32>
    %18 = arith.select %12, %16, %17 : vector<8x128xi1>, vector<8x128xf32>
    %cst_5 = arith.constant 1.000000e+00 : f32
    %19 = vector.broadcast %cst_5 : f32 to vector<8x128xf32>
    %20 = arith.cmpf oeq, %7, %19 : vector<8x128xf32>
    %21 = arith.andi %20, %12 : vector<8x128xi1>
    %cst_6 = arith.constant 0.000000e+00 : f32
    %22 = vector.broadcast %cst_6 : f32 to vector<8x128xf32>
    %23 = arith.cmpf oeq, %7, %22 : vector<8x128xf32>
    %24 = arith.andi %23, %12 : vector<8x128xi1>
    %25 = arith.extui %21 : vector<8x128xi1> to vector<8x128xi32>
    %26 = arith.sitofp %25 : vector<8x128xi32> to vector<8x128xf32>
    %27 = arith.extui %24 : vector<8x128xi1> to vector<8x128xi32>
    %28 = arith.sitofp %27 : vector<8x128xi32> to vector<8x128xf32>
    %cst_7 = arith.constant 1.000000e+00 : f32
    %29 = vector.broadcast %cst_7 : f32 to vector<8x128xf32>
    %30 = arith.subf %29, %18 : vector<8x128xf32>
    %31 = arith.select %21, %18, %30 : vector<8x128xi1>, vector<8x128xf32>
    %cst_8 = arith.constant 1.000000e+00 : f32
    %32 = vector.broadcast %cst_8 : f32 to vector<8x128xf32>
    %33 = arith.subf %32, %31 : vector<8x128xf32>
    %34 = arith.mulf %33, %33 : vector<8x128xf32>
    %35 = math.log %31 : vector<8x128xf32>
    %36 = arith.mulf %34, %35 : vector<8x128xf32>
    %37 = arith.mulf %36, %26 : vector<8x128xf32>
    %38 = vector.shape_cast %37 : vector<8x128xf32> to vector<1x8x128xf32>
    %cst_9 = arith.constant dense<0.000000e+00> : vector<8x128xf32>
    %39 = vector.multi_reduction <add>, %38, %cst_9 [0] : vector<1x8x128xf32> to vector<8x128xf32>
    %40 = arith.mulf %36, %28 : vector<8x128xf32>
    %41 = vector.shape_cast %40 : vector<8x128xf32> to vector<1x8x128xf32>
    %cst_10 = arith.constant dense<0.000000e+00> : vector<8x128xf32>
    %42 = vector.multi_reduction <add>, %41, %cst_10 [0] : vector<1x8x128xf32> to vector<8x128xf32>
    %43 = vector.shape_cast %26 : vector<8x128xf32> to vector<1x8x128xf32>
    %cst_11 = arith.constant dense<0.000000e+00> : vector<8x128xf32>
    %44 = vector.multi_reduction <add>, %43, %cst_11 [0] : vector<1x8x128xf32> to vector<8x128xf32>
    %45 = vector.shape_cast %28 : vector<8x128xf32> to vector<1x8x128xf32>
    %cst_12 = arith.constant dense<0.000000e+00> : vector<8x128xf32>
    %46 = vector.multi_reduction <add>, %45, %cst_12 [0] : vector<1x8x128xf32> to vector<8x128xf32>
    %c0_13 = arith.constant 0 : index
    %c0_14 = arith.constant 0 : index
    %c0_15 = arith.constant 0 : index
    %c0_16 = arith.constant 0 : index
    %47 = vector.load %arg3[%c0_13, %c0_14, %c0_15, %c0_16] : memref<1x4x8x128xf32, #tpu.memory_space<vmem>>, vector<1x1x8x128xf32>
    %48 = vector.shape_cast %47 : vector<1x1x8x128xf32> to vector<8x128xf32>
    %49 = vector.shape_cast %39 : vector<8x128xf32> to vector<1x1x8x128xf32>
    tpu.vector_store %arg3[%c0_13, %c0_14, %c0_15, %c0_16], %49 {strides = array<i32>} : memref<1x4x8x128xf32, #tpu.memory_space<vmem>>, vector<1x1x8x128xf32>,
    %c0_17 = arith.constant 0 : index
    %c1 = arith.constant 1 : index
    %c0_18 = arith.constant 0 : index
    %c0_19 = arith.constant 0 : index
    %50 = vector.load %arg3[%c0_17, %c1, %c0_18, %c0_19] : memref<1x4x8x128xf32, #tpu.memory_space<vmem>>, vector<1x1x8x128xf32>
    %51 = vector.shape_cast %50 : vector<1x1x8x128xf32> to vector<8x128xf32>
    %52 = vector.shape_cast %42 : vector<8x128xf32> to vector<1x1x8x128xf32>
    tpu.vector_store %arg3[%c0_17, %c1, %c0_18, %c0_19], %52 {strides = array<i32>} : memref<1x4x8x128xf32, #tpu.memory_space<vmem>>, vector<1x1x8x128xf32>,
    %c0_20 = arith.constant 0 : index
    %c2 = arith.constant 2 : index
    %c0_21 = arith.constant 0 : index
    %c0_22 = arith.constant 0 : index
    %53 = vector.load %arg3[%c0_20, %c2, %c0_21, %c0_22] : memref<1x4x8x128xf32, #tpu.memory_space<vmem>>, vector<1x1x8x128xf32>
    %54 = vector.shape_cast %53 : vector<1x1x8x128xf32> to vector<8x128xf32>
    %55 = vector.shape_cast %44 : vector<8x128xf32> to vector<1x1x8x128xf32>
    tpu.vector_store %arg3[%c0_20, %c2, %c0_21, %c0_22], %55 {strides = array<i32>} : memref<1x4x8x128xf32, #tpu.memory_space<vmem>>, vector<1x1x8x128xf32>,
    %c0_23 = arith.constant 0 : index
    %c3 = arith.constant 3 : index
    %c0_24 = arith.constant 0 : index
    %c0_25 = arith.constant 0 : index
    %56 = vector.load %arg3[%c0_23, %c3, %c0_24, %c0_25] : memref<1x4x8x128xf32, #tpu.memory_space<vmem>>, vector<1x1x8x128xf32>
    %57 = vector.shape_cast %56 : vector<1x1x8x128xf32> to vector<8x128xf32>
    %58 = vector.shape_cast %46 : vector<8x128xf32> to vector<1x1x8x128xf32>
    tpu.vector_store %arg3[%c0_23, %c3, %c0_24, %c0_25], %58 {strides = array<i32>} : memref<1x4x8x128xf32, #tpu.memory_space<vmem>>, vector<1x1x8x128xf32>,
    return
  }
  func.func @transform_0(%arg0: i32) -> (i32, i32) {
    %c0_i32 = arith.constant 0 : i32
    %c0_i32_0 = arith.constant 0 : i32
    return %arg0, %c0_i32 : i32, i32
  }
  func.func @transform_1(%arg0: i32) -> (i32, i32) {
    %c0_i32 = arith.constant 0 : i32
    %c0_i32_0 = arith.constant 0 : i32
    return %arg0, %c0_i32 : i32, i32
  }
  func.func @transform_2(%arg0: i32) -> (i32, i32, i32, i32) {
    %c0_i32 = arith.constant 0 : i32
    %c0_i32_0 = arith.constant 0 : i32
    %c0_i32_1 = arith.constant 0 : i32
    %c0_i32_2 = arith.constant 0 : i32
    return %arg0, %c0_i32, %c0_i32_0, %c0_i32_1 : i32, i32, i32, i32
  }
}

</mosaic_0001>

<bundles_post_ra>
// kernel: binary_focal_loss.1
= control target key start
LH: loop header
LB: loop body
LE: loop exit
PB: predicated region body
PF: predicated region fallthrough
CT: control target
= control target key end

     0   :  { %s321_s9 = smov 0   ;;  %s341_s0 = inlined_call_operand.vmem [shape: f32[16,128], index: 0, kind: input, shape index: {}]   ;;  %s342_s1 = inlined_call_operand.vmem [shape: f32[16,128], index: 1, kind: input, shape index: {}]   ;;  %s343_s2 = inlined_call_operand.vmem [shape: f32[2,4,8,128], index: 2, kind: output, shape index: {}]  }
   0x1 LB: > { %s268_s10 = sadd.s32 4294967295, %s303_s9   ;;  %p272_p0 = scmp.ge.s32.totalorder %s303_s9, 1  ;;  %s303_s9 = sphi %s321_s9, %s12_s9  }
   0x2   : > { %p120_p1 = scmp.lt.s32.totalorder %s303_s9, 3 }
   0x4   : > { %p121_p2 = pnand %p272_p0, %p120_p1 }
   0x5   : > { %p145_p3 = scmp.lt.s32.totalorder (!%p121_p2), %s268_s10, 1  ;;  %v159_v0 = vlaneseq (!%p121_p2)  ;;  %s277_s11 = sshll.u32 (!%p121_p2), %s268_s10, 10  ;;  %v305_v12 = vmov (!%p121_p2), 0.0  }
   0x6   : > { %124 = sbr.rel (%p121_p2) target bundleno = 43 (0x2b), region = 28  ;;  %v167_v4 = vstv (!%p121_p2), %s277_s11 }
   0x7   : > { %v160_v1 = vshrl.u32 (!%p121_p2), %v159_v0, 7  ;;  %v162_v2 = vand.u32 (!%p121_p2), 127, %v159_v0 }
   0x9   : > { %v163_v3 = vmul.u32 (!%p121_p2), 128, %v160_v1 }
   0xb   : > { %v164_v5 = vadd.s32 (!%p121_p2), %v163_v3, %v162_v2 }
   0xd   : > { %s345_s10 = smov (!%p145_p3, %s268_s10), 1  ;;  %v168_v9 = vadd.s32 %v167_v4, %v164_v5 }
   0xe   : > { %s273_s12 = sshll.u32 %s345_s10, 3  ;;  %s285_s19 = sshll.u32 %s345_s10, 5 }
   0xf   : > { %s148_s15 = scalar_lea.vmem %s341_s0, %s273_s12  ;;  %s152_s18 = scalar_lea.vmem %s342_s1, %s273_s12  ;;  %vm169_vm2 = vcmp.lt.s32.totalorder %v168_v9, 2048 }
  0x10   : > { %v165_v6 = vld [vmem:[%s148_s15] sm:$0xff]  ;;  %s157_s22 = scalar_lea.vmem %s343_s2, %s285_s19 }
  0x11   : > { %v166_v7 = vld [vmem:[%s152_s18] sm:$0xff]  ;;  %v170_v8 = vmax.f32 %v165_v6, 1e-06 }
  0x12   : > { %vm173_vm0 = vcmp.eq.f32.partialorder %v166_v7, 1.0  ;;  %vm175_vm1 = vcmp.eq.f32.partialorder %v166_v7, 0.0 }
  0x13   : > { %v171_v10 = vmin.f32 %v170_v8, 0.999999  ;;  %vm174_vm3 = vmand %vm173_vm0, %vm169_vm2 }
  0x14   : > { %v278_v13 = vsel %vm174_vm3, 1.0, %v305_v12  ;;  %vm176_vm4 = vmand %vm175_vm1, %vm169_vm2 }
  0x15   : > { %v172_v11 = vsel %vm169_vm2, %v171_v10, 0.5  ;;  %281 = vst [vmem:[%s157_s22 + $0x10] sm:$0xff] %v278_v13  ;;  %v279_v15 = vsel %vm176_vm4, 1.0, %v305_v12 }
  0x16   : > { %v181_v14 = vsub.f32 1.0, %v172_v11  ;;  %282 = vst [vmem:[%s157_s22 + $0x18] sm:$0xff] %v279_v15 }
  0x18   : > { %v182_v16 = vsel %vm174_vm3, %v172_v11, %v181_v14 }
  0x19   : > { %295 = vlog2.f32 %v182_v16  ;;  %v183_v17 = vsub.f32 1.0, %v182_v16 }
  0x1b   : > { %v184_v18 = vmul.f32 %v183_v17, %v183_v17 }
  0x23   : > { %v296_v19 = vpop.eup %295 }
  0x24   : > { %v186_v20 = vmul.f32 0.6931472, %v296_v19 }
  0x26   : > { %v187_v21 = vmul.f32 %v186_v20, %v184_v18 }
  0x28   : > { %v188_v22 = vmul.f32 %v278_v13, %v187_v21  ;;  %v190_v23 = vmul.f32 %v279_v15, %v187_v21 }
  0x2a   : > { %194 = vst [vmem:[%s157_s22] sm:$0xff] %v188_v22  ;;  %280 = vst [vmem:[%s157_s22 + $0x8] sm:$0xff] %v190_v23 }
  0x2b PF: > { %s12_s9 = sadd.s32 1, %s303_s9  }
  0x2c   : > { %p9_p4 = scmp.ge.s32.totalorder %s12_s9, 4  }
  0x2e   :  { %11 = sbr.rel (!%p9_p4) target bundleno = 1 (0x1), region = 64 }

</bundles_post_ra>
